<compile_context>
chip_gen: v7x
topology: tpu7x:2x2x1
jax: 0.10.0
libtpu: 0.0.40
codegen_flags: <defaults>
</compile_context>

<pallas_src>
import functools

import jax
import jax.numpy as jnp
from jax.experimental import pallas as pl
from jax.experimental.pallas import tpu as pltpu

# ----------------------------- hyper-parameters -----------------------------
INPUT_DIM = 32
NHEAD = 4
NUM_LAYERS = 2          # present in __init__ but unused by forward()
DIM_FF = 64
DROPOUT = 0.1           # eval mode -> no-op
DEC_HIDDEN = 128

BATCH = 2
SEQ = 8


# --------------------------------- kernel -----------------------------------
def attention_mlp_kernel(
    x_ref,                      # (Bb*S, Fin)   flattened rows, row = b*S + s
    w_cat_ref, b_cat_ref,       # (Fin, 4D), (1, 4D)   layout [h | q*scale | k | v]
    seg_ref, segt_ref,          # (D, H), (H, D)       0/1 head-segment matrices
    w_ao_ref, b_ao_ref,         # (D, D), (1, D)       attention out_proj
    w_r1_ref, b_r1_ref,         # (D, D), (1, D)
    w_r2_ref, b_r2_ref,         # (D, D), (1, D)
    w_d1_ref, b_d1_ref,         # (D, 128), (1, 128)
    w_d2_ref, b_d2_ref,         # (1, 128), (1, 1)
    out_ref,                    # (Bb, 1)
    *, num_heads, seq_len,
):
    rows = x_ref.shape[0]
    S = seq_len
    Bb = rows // S
    H = num_heads
    D = w_ao_ref.shape[0]

    # ---- fused input projection + (scaled-Q)/K/V projection: one MXU pass ----
    cat = jnp.dot(x_ref[...], w_cat_ref[...],
                  preferred_element_type=jnp.float32) + b_cat_ref[...]   # (rows, 4D)
    # Split the row dim at sublane granularity (S == 8); layout-compatible.
    cat3 = cat.reshape(Bb, S, 4 * D)

    h_last = cat3[:, S - 1, 0:D]                 # (Bb, D)    projected input, last pos
    q_last = cat3[:, S - 1:S, D:2 * D]           # (Bb, 1, D) scale already folded in
    k_all = cat3[:, :, 2 * D:3 * D]              # (Bb, S, D)
    v_all = cat3[:, :, 3 * D:4 * D]              # (Bb, S, D)

    # ---- multi-head attention for the last query position, all heads at once ----
    # scores[b,k,h] = sum_{j in head h} q_last[b,j] * k[b,k,j]
    prod = q_last * k_all                        # (Bb, S, D)  VPU, sublane broadcast
    s = jnp.dot(prod.reshape(rows, D), seg_ref[...],
                preferred_element_type=jnp.float32).reshape(Bb, S, H)    # (Bb, S, H)

    m = jnp.max(s, axis=1, keepdims=True)        # (Bb, 1, H)
    e = jnp.exp(s - m)                           # (Bb, S, H)
    denom = jnp.sum(e, axis=1, keepdims=True)    # (Bb, 1, H)
    p = e * pl.reciprocal(denom, approx=True)    # (Bb, S, H) softmax over S

    # expand each head's weight across its Dh lanes, then weight the values
    p_exp = jnp.dot(p.reshape(rows, H), segt_ref[...],
                    preferred_element_type=jnp.float32).reshape(Bb, S, D)  # (Bb,S,D)
    o = jnp.sum(p_exp * v_all, axis=1)           # (Bb, D) == concat_h(o_h)

    attn = jnp.dot(o, w_ao_ref[...],
                   preferred_element_type=jnp.float32) + b_ao_ref[...]     # (Bb, D)
    # residual add (dropout is identity in eval mode)
    h = h_last + attn

    # ---- residual MLP block (position-wise; only last position needed) ------
    r = jnp.dot(h, w_r1_ref[...], preferred_element_type=jnp.float32) + b_r1_ref[...]
    r = jnp.maximum(r, 0.0)
    r = jnp.dot(r, w_r2_ref[...], preferred_element_type=jnp.float32) + b_r2_ref[...]
    h = h + r

    # ---- MLP decoder ---------------------------------------------------------
    d = jnp.dot(h, w_d1_ref[...], preferred_element_type=jnp.float32) + b_d1_ref[...]
    d = jnp.maximum(d, 0.0)
    # 128 -> 1 projection on VPU (multiply) + lane reduce; keeps the MXU free.
    logit = jnp.sum(d * w_d2_ref[...], axis=-1, keepdims=True) + b_d2_ref[...]
    out_ref[...] = jax.nn.sigmoid(logit)                                   # (Bb, 1)


# --------------------------- parameter preparation ---------------------------
def prepare_params(params, *, num_heads=NHEAD):
    """One-time weight transform: fuse input+QKV projections, fold softmax scale,
    build the 0/1 head-segment matrices, transpose the final decoder column."""
    D = params["w_in"].shape[1]
    H = num_heads
    Dh = D // H
    scale = 1.0 / float(Dh) ** 0.5

    w_in, b_in = params["w_in"], params["b_in"]
    w_q = params["w_qkv"][:, 0:D] * scale
    w_k = params["w_qkv"][:, D:2 * D]
    w_v = params["w_qkv"][:, 2 * D:3 * D]
    b_q = params["b_qkv"][:, 0:D] * scale
    b_k = params["b_qkv"][:, D:2 * D]
    b_v = params["b_qkv"][:, 2 * D:3 * D]

    w_cat = jnp.concatenate([w_in, w_in @ w_q, w_in @ w_k, w_in @ w_v], axis=1)
    b_cat = jnp.concatenate(
        [b_in, b_in @ w_q + b_q, b_in @ w_k + b_k, b_in @ w_v + b_v], axis=1)

    head_of_col = jnp.arange(D) // Dh
    seg = (head_of_col[:, None] == jnp.arange(H)[None, :]).astype(jnp.float32)  # (D,H)

    return {
        "w_cat": w_cat, "b_cat": b_cat,
        "seg": seg, "seg_t": seg.T,
        "w_ao": params["w_ao"], "b_ao": params["b_ao"],
        "w_r1": params["w_r1"], "b_r1": params["b_r1"],
        "w_r2": params["w_r2"], "b_r2": params["b_r2"],
        "w_d1": params["w_d1"], "b_d1": params["b_d1"],
        "w_d2_row": params["w_d2"].T, "b_d2": params["b_d2"],
    }


# -------------------------------- wrapper ------------------------------------
def attention_mlp(x, prepared, *, num_heads=NHEAD, batch_block=None):
    B, S, Fin = x.shape
    if batch_block is None or B % batch_block != 0:
        batch_block = B                    # single block; do NOT add a grid for tiny B
    num_blocks = B // batch_block
    x_flat = x.reshape(B * S, Fin)         # wrapper-side reshape: free layout plumbing

    weights = (
        prepared["w_cat"], prepared["b_cat"],
        prepared["seg"], prepared["seg_t"],
        prepared["w_ao"], prepared["b_ao"],
        prepared["w_r1"], prepared["b_r1"],
        prepared["w_r2"], prepared["b_r2"],
        prepared["w_d1"], prepared["b_d1"],
        prepared["w_d2_row"], prepared["b_d2"],
    )

    in_specs = [pl.BlockSpec((batch_block * S, Fin), lambda i: (i, 0))]
    in_specs += [pl.BlockSpec(w.shape, lambda i, _n=w.ndim: (0,) * _n) for w in weights]
    out_spec = pl.BlockSpec((batch_block, 1), lambda i: (i, 0))

    return pl.pallas_call(
        functools.partial(attention_mlp_kernel, num_heads=num_heads, seq_len=S),
        out_shape=jax.ShapeDtypeStruct((B, 1), jnp.float32),
        grid=(num_blocks,),
        in_specs=in_specs,
        out_specs=out_spec,
        compiler_params=pltpu.CompilerParams(
            dimension_semantics=("parallel",)),   # megacore sharding when batched (v7x)
    )(x_flat, *weights)


# ----------------------- pure-JAX reference (for checking) -------------------
def attention_mlp_ref(x, params, *, num_heads=NHEAD):
    B, S, _ = x.shape
    D = params["w_in"].shape[1]
    H = num_heads
    Dh = D // H
    h = x @ params["w_in"] + params["b_in"]                 # (B, S, D)
    qkv = h @ params["w_qkv"] + params["b_qkv"]
    q, k, v = qkv[..., :D], qkv[..., D:2 * D], qkv[..., 2 * D:]
    q = q.reshape(B, S, H, Dh)
    k = k.reshape(B, S, H, Dh)
    v = v.reshape(B, S, H, Dh)
    s = jnp.einsum("bqhd,bkhd->bhqk", q, k) / jnp.sqrt(Dh).astype(jnp.float32)
    p = jax.nn.softmax(s, axis=-1)
    a = jnp.einsum("bhqk,bkhd->bqhd", p, v).reshape(B, S, D)
    a = a @ params["w_ao"] + params["b_ao"]
    h = h + a
    r = jnp.maximum(h @ params["w_r1"] + params["b_r1"], 0.0)
    r = r @ params["w_r2"] + params["b_r2"]
    h = h + r
    last = h[:, -1, :]
    d = jnp.maximum(last @ params["w_d1"] + params["b_d1"], 0.0)
    d = d @ params["w_d2"] + params["b_d2"]
    return jax.nn.sigmoid(d)


# --------------------------- deterministic params ----------------------------
def init_params(key, input_dim=INPUT_DIM, d=DIM_FF, dec_hidden=DEC_HIDDEN):
    ks = jax.random.split(key, 16)

    def lin(kw, fan_in, fan_out):
        return jax.random.normal(kw, (fan_in, fan_out), jnp.float32) * (1.0 / fan_in) ** 0.5

    def bias(kb, fan_out):
        return jax.random.normal(kb, (1, fan_out), jnp.float32) * 0.02

    return {
        "w_in":  lin(ks[0], input_dim, d),   "b_in":  bias(ks[1], d),
        "w_qkv": lin(ks[2], d, 3 * d),       "b_qkv": bias(ks[3], 3 * d),
        "w_ao":  lin(ks[4], d, d),           "b_ao":  bias(ks[5], d),
        "w_r1":  lin(ks[6], d, d),           "b_r1":  bias(ks[7], d),
        "w_r2":  lin(ks[8], d, d),           "b_r2":  bias(ks[9], d),
        "w_d1":  lin(ks[10], d, dec_hidden), "b_d1":  bias(ks[11], dec_hidden),
        "w_d2":  lin(ks[12], dec_hidden, 1), "b_d2":  bias(ks[13], 1),
    }


if __name__ == "__main__":
    key = jax.random.PRNGKey(0)
    kx, kp, kx2 = jax.random.split(key, 3)
    params = init_params(kp)
    prepared = prepare_params(params)

    # tolerance accounts for the approximate EUP reciprocal in the softmax (still
    # far tighter than any structural error would produce on a sigmoid output).
    ATOL = RTOL = 2e-3

    # small shapes consistent with the module: batch=2, seq=8, input_dim=32
    x = jax.random.normal(kx, (BATCH, SEQ, INPUT_DIM), jnp.float32)
    out = jax.block_until_ready(attention_mlp(x, prepared))
    ref = attention_mlp_ref(x, params)
    assert out.shape == (BATCH, 1)
    assert jnp.allclose(out, ref, atol=ATOL, rtol=RTOL), (out, ref)

    # larger per-call batch + parallel batch grid (the main throughput lever;
    # on v7x the two TensorCores each take half of the batch blocks).
    xb = jax.random.normal(kx2, (16, SEQ, INPUT_DIM), jnp.float32)
    outb = jax.block_until_ready(attention_mlp(xb, prepared, batch_block=8))
    refb = attention_mlp_ref(xb, params)
    assert outb.shape == (16, 1)
    assert jnp.allclose(outb, refb, atol=ATOL, rtol=RTOL), (outb, refb)

    print("KERNEL_OK")
</pallas_src>

<mosaic_0001>
module attributes {stable_mosaic.version = 11 : i64} {
  func.func @attention_mlp_kernel(%arg0: i32, %arg1: memref<16x32xf32, #tpu.memory_space<vmem>>, %arg2: memref<32x256xf32, #tpu.memory_space<vmem>>, %arg3: memref<1x256xf32, #tpu.memory_space<vmem>>, %arg4: memref<64x4xf32, #tpu.memory_space<vmem>>, %arg5: memref<4x64xf32, #tpu.memory_space<vmem>>, %arg6: memref<64x64xf32, #tpu.memory_space<vmem>>, %arg7: memref<1x64xf32, #tpu.memory_space<vmem>>, %arg8: memref<64x64xf32, #tpu.memory_space<vmem>>, %arg9: memref<1x64xf32, #tpu.memory_space<vmem>>, %arg10: memref<64x64xf32, #tpu.memory_space<vmem>>, %arg11: memref<1x64xf32, #tpu.memory_space<vmem>>, %arg12: memref<64x128xf32, #tpu.memory_space<vmem>>, %arg13: memref<1x128xf32, #tpu.memory_space<vmem>>, %arg14: memref<1x128xf32, #tpu.memory_space<vmem>>, %arg15: memref<1x1xf32, #tpu.memory_space<vmem>>, %arg16: memref<2x1xf32, #tpu.memory_space<vmem>>) attributes {dimension_semantics = [#tpu.dimension_semantics<parallel>], iteration_bounds = array<i64: 1>, scalar_prefetch = 0 : i64, scratch_operands = 0 : i64, tpu.core_type = #tpu.core_type<tc>, window_params = [{transform_indices = @transform_0, window_bounds = array<i64: 16, 32>}, {pipeline_mode = #tpu.pipeline_mode<synchronous>, transform_indices = @transform_1, window_bounds = array<i64: 32, 256>}, {pipeline_mode = #tpu.pipeline_mode<synchronous>, transform_indices = @transform_2, window_bounds = array<i64: 1, 256>}, {pipeline_mode = #tpu.pipeline_mode<synchronous>, transform_indices = @transform_3, window_bounds = array<i64: 64, 4>}, {pipeline_mode = #tpu.pipeline_mode<synchronous>, transform_indices = @transform_4, window_bounds = array<i64: 4, 64>}, {pipeline_mode = #tpu.pipeline_mode<synchronous>, transform_indices = @transform_5, window_bounds = array<i64: 64, 64>}, {pipeline_mode = #tpu.pipeline_mode<synchronous>, transform_indices = @transform_6, window_bounds = array<i64: 1, 64>}, {pipeline_mode = #tpu.pipeline_mode<synchronous>, transform_indices = @transform_7, window_bounds = array<i64: 64, 64>}, {pipeline_mode = #tpu.pipeline_mode<synchronous>, transform_indices = @transform_8, window_bounds = array<i64: 1, 64>}, {pipeline_mode = #tpu.pipeline_mode<synchronous>, transform_indices = @transform_9, window_bounds = array<i64: 64, 64>}, {pipeline_mode = #tpu.pipeline_mode<synchronous>, transform_indices = @transform_10, window_bounds = array<i64: 1, 64>}, {pipeline_mode = #tpu.pipeline_mode<synchronous>, transform_indices = @transform_11, window_bounds = array<i64: 64, 128>}, {pipeline_mode = #tpu.pipeline_mode<synchronous>, transform_indices = @transform_12, window_bounds = array<i64: 1, 128>}, {pipeline_mode = #tpu.pipeline_mode<synchronous>, transform_indices = @transform_13, window_bounds = array<i64: 1, 128>}, {pipeline_mode = #tpu.pipeline_mode<synchronous>, transform_indices = @transform_14, window_bounds = array<i64: 1, 1>}, {transform_indices = @transform_15, window_bounds = array<i64: 2, 1>}]} {
    %c0 = arith.constant 0 : index
    %c0_0 = arith.constant 0 : index
    %0 = vector.load %arg1[%c0, %c0_0] : memref<16x32xf32, #tpu.memory_space<vmem>>, vector<16x32xf32>
    %c0_1 = arith.constant 0 : index
    %c0_2 = arith.constant 0 : index
    %1 = vector.load %arg2[%c0_1, %c0_2] : memref<32x256xf32, #tpu.memory_space<vmem>>, vector<32x256xf32>
    %cst = arith.constant dense<0.000000e+00> : vector<16x256xf32>
    %2 = tpu.matmul %0, %1, %cst {dimension_numbers = #tpu.dot_dimension_numbers<[1], [0], [0], [1], [0, 0, 1, 1], [], []>} : vector<16x32xf32>, vector<32x256xf32>, vector<16x256xf32> -> vector<16x256xf32>
    %c0_3 = arith.constant 0 : index
    %c0_4 = arith.constant 0 : index
    %3 = vector.load %arg3[%c0_3, %c0_4] : memref<1x256xf32, #tpu.memory_space<vmem>>, vector<1x256xf32>
    %4 = vector.broadcast %3 : vector<1x256xf32> to vector<16x256xf32>
    %5 = arith.addf %2, %4 : vector<16x256xf32>
    %6 = vector.shape_cast %5 : vector<16x256xf32> to vector<2x8x256xf32>
    %7 = vector.extract_strided_slice %6 {offsets = [0, 7, 0], sizes = [2, 1, 64], strides = [1, 1, 1]} : vector<2x8x256xf32> to vector<2x1x64xf32>
    %8 = vector.shape_cast %7 : vector<2x1x64xf32> to vector<2x64xf32>
    %9 = vector.extract_strided_slice %6 {offsets = [0, 7, 64], sizes = [2, 1, 64], strides = [1, 1, 1]} : vector<2x8x256xf32> to vector<2x1x64xf32>
    %10 = vector.extract_strided_slice %6 {offsets = [0, 0, 128], sizes = [2, 8, 64], strides = [1, 1, 1]} : vector<2x8x256xf32> to vector<2x8x64xf32>
    %11 = vector.extract_strided_slice %6 {offsets = [0, 0, 192], sizes = [2, 8, 64], strides = [1, 1, 1]} : vector<2x8x256xf32> to vector<2x8x64xf32>
    %12 = vector.broadcast %9 : vector<2x1x64xf32> to vector<2x8x64xf32>
    %13 = arith.mulf %12, %10 : vector<2x8x64xf32>
    %14 = vector.shape_cast %13 : vector<2x8x64xf32> to vector<16x64xf32>
    %c0_5 = arith.constant 0 : index
    %c0_6 = arith.constant 0 : index
    %15 = vector.load %arg4[%c0_5, %c0_6] : memref<64x4xf32, #tpu.memory_space<vmem>>, vector<64x4xf32>
    %cst_7 = arith.constant dense<0.000000e+00> : vector<16x4xf32>
    %16 = tpu.matmul %14, %15, %cst_7 {dimension_numbers = #tpu.dot_dimension_numbers<[1], [0], [0], [1], [0, 0, 1, 1], [], []>} : vector<16x64xf32>, vector<64x4xf32>, vector<16x4xf32> -> vector<16x4xf32>
    %17 = vector.shape_cast %16 : vector<16x4xf32> to vector<2x8x4xf32>
    %cst_8 = arith.constant dense<0xFF800000> : vector<2x4xf32>
    %18 = vector.multi_reduction <maximumf>, %17, %cst_8 [1] : vector<2x8x4xf32> to vector<2x4xf32>
    %19 = vector.shape_cast %18 : vector<2x4xf32> to vector<2x1x4xf32>
    %20 = vector.broadcast %19 : vector<2x1x4xf32> to vector<2x8x4xf32>
    %21 = arith.subf %17, %20 : vector<2x8x4xf32>
    %22 = math.exp %21 : vector<2x8x4xf32>
    %cst_9 = arith.constant dense<0.000000e+00> : vector<2x4xf32>
    %23 = vector.multi_reduction <add>, %22, %cst_9 [1] : vector<2x8x4xf32> to vector<2x4xf32>
    %24 = vector.shape_cast %23 : vector<2x4xf32> to vector<2x1x4xf32>
    %25 = tpu.reciprocal %24 {approx = true} : vector<2x1x4xf32> -> vector<2x1x4xf32>
    %26 = vector.broadcast %25 : vector<2x1x4xf32> to vector<2x8x4xf32>
    %27 = arith.mulf %22, %26 : vector<2x8x4xf32>
    %28 = vector.shape_cast %27 : vector<2x8x4xf32> to vector<16x4xf32>
    %c0_10 = arith.constant 0 : index
    %c0_11 = arith.constant 0 : index
    %29 = vector.load %arg5[%c0_10, %c0_11] : memref<4x64xf32, #tpu.memory_space<vmem>>, vector<4x64xf32>
    %cst_12 = arith.constant dense<0.000000e+00> : vector<16x64xf32>
    %30 = tpu.matmul %28, %29, %cst_12 {dimension_numbers = #tpu.dot_dimension_numbers<[1], [0], [0], [1], [0, 0, 1, 1], [], []>} : vector<16x4xf32>, vector<4x64xf32>, vector<16x64xf32> -> vector<16x64xf32>
    %31 = vector.shape_cast %30 : vector<16x64xf32> to vector<2x8x64xf32>
    %32 = arith.mulf %31, %11 : vector<2x8x64xf32>
    %cst_13 = arith.constant dense<0.000000e+00> : vector<2x64xf32>
    %33 = vector.multi_reduction <add>, %32, %cst_13 [1] : vector<2x8x64xf32> to vector<2x64xf32>
    %c0_14 = arith.constant 0 : index
    %c0_15 = arith.constant 0 : index
    %34 = vector.load %arg6[%c0_14, %c0_15] : memref<64x64xf32, #tpu.memory_space<vmem>>, vector<64x64xf32>
    %cst_16 = arith.constant dense<0.000000e+00> : vector<2x64xf32>
    %35 = tpu.matmul %33, %34, %cst_16 {dimension_numbers = #tpu.dot_dimension_numbers<[1], [0], [0], [1], [0, 0, 1, 1], [], []>} : vector<2x64xf32>, vector<64x64xf32>, vector<2x64xf32> -> vector<2x64xf32>
    %c0_17 = arith.constant 0 : index
    %c0_18 = arith.constant 0 : index
    %36 = vector.load %arg7[%c0_17, %c0_18] : memref<1x64xf32, #tpu.memory_space<vmem>>, vector<1x64xf32>
    %37 = vector.broadcast %36 : vector<1x64xf32> to vector<2x64xf32>
    %38 = arith.addf %35, %37 : vector<2x64xf32>
    %39 = arith.addf %8, %38 : vector<2x64xf32>
    %c0_19 = arith.constant 0 : index
    %c0_20 = arith.constant 0 : index
    %40 = vector.load %arg8[%c0_19, %c0_20] : memref<64x64xf32, #tpu.memory_space<vmem>>, vector<64x64xf32>
    %cst_21 = arith.constant dense<0.000000e+00> : vector<2x64xf32>
    %41 = tpu.matmul %39, %40, %cst_21 {dimension_numbers = #tpu.dot_dimension_numbers<[1], [0], [0], [1], [0, 0, 1, 1], [], []>} : vector<2x64xf32>, vector<64x64xf32>, vector<2x64xf32> -> vector<2x64xf32>
    %c0_22 = arith.constant 0 : index
    %c0_23 = arith.constant 0 : index
    %42 = vector.load %arg9[%c0_22, %c0_23] : memref<1x64xf32, #tpu.memory_space<vmem>>, vector<1x64xf32>
    %43 = vector.broadcast %42 : vector<1x64xf32> to vector<2x64xf32>
    %44 = arith.addf %41, %43 : vector<2x64xf32>
    %cst_24 = arith.constant 0.000000e+00 : f32
    %45 = vector.broadcast %cst_24 : f32 to vector<2x64xf32>
    %46 = arith.maximumf %44, %45 : vector<2x64xf32>
    %c0_25 = arith.constant 0 : index
    %c0_26 = arith.constant 0 : index
    %47 = vector.load %arg10[%c0_25, %c0_26] : memref<64x64xf32, #tpu.memory_space<vmem>>, vector<64x64xf32>
    %cst_27 = arith.constant dense<0.000000e+00> : vector<2x64xf32>
    %48 = tpu.matmul %46, %47, %cst_27 {dimension_numbers = #tpu.dot_dimension_numbers<[1], [0], [0], [1], [0, 0, 1, 1], [], []>} : vector<2x64xf32>, vector<64x64xf32>, vector<2x64xf32> -> vector<2x64xf32>
    %c0_28 = arith.constant 0 : index
    %c0_29 = arith.constant 0 : index
    %49 = vector.load %arg11[%c0_28, %c0_29] : memref<1x64xf32, #tpu.memory_space<vmem>>, vector<1x64xf32>
    %50 = vector.broadcast %49 : vector<1x64xf32> to vector<2x64xf32>
    %51 = arith.addf %48, %50 : vector<2x64xf32>
    %52 = arith.addf %39, %51 : vector<2x64xf32>
    %c0_30 = arith.constant 0 : index
    %c0_31 = arith.constant 0 : index
    %53 = vector.load %arg12[%c0_30, %c0_31] : memref<64x128xf32, #tpu.memory_space<vmem>>, vector<64x128xf32>
    %cst_32 = arith.constant dense<0.000000e+00> : vector<2x128xf32>
    %54 = tpu.matmul %52, %53, %cst_32 {dimension_numbers = #tpu.dot_dimension_numbers<[1], [0], [0], [1], [0, 0, 1, 1], [], []>} : vector<2x64xf32>, vector<64x128xf32>, vector<2x128xf32> -> vector<2x128xf32>
    %c0_33 = arith.constant 0 : index
    %c0_34 = arith.constant 0 : index
    %55 = vector.load %arg13[%c0_33, %c0_34] : memref<1x128xf32, #tpu.memory_space<vmem>>, vector<1x128xf32>
    %56 = vector.broadcast %55 : vector<1x128xf32> to vector<2x128xf32>
    %57 = arith.addf %54, %56 : vector<2x128xf32>
    %cst_35 = arith.constant 0.000000e+00 : f32
    %58 = vector.broadcast %cst_35 : f32 to vector<2x128xf32>
    %59 = arith.maximumf %57, %58 : vector<2x128xf32>
    %c0_36 = arith.constant 0 : index
    %c0_37 = arith.constant 0 : index
    %60 = vector.load %arg14[%c0_36, %c0_37] : memref<1x128xf32, #tpu.memory_space<vmem>>, vector<1x128xf32>
    %61 = vector.broadcast %60 : vector<1x128xf32> to vector<2x128xf32>
    %62 = arith.mulf %59, %61 : vector<2x128xf32>
    %cst_38 = arith.constant dense<0.000000e+00> : vector<2xf32>
    %63 = vector.multi_reduction <add>, %62, %cst_38 [1] : vector<2x128xf32> to vector<2xf32>
    %64 = vector.shape_cast %63 : vector<2xf32> to vector<2x1xf32>
    %c0_39 = arith.constant 0 : index
    %c0_40 = arith.constant 0 : index
    %65 = vector.load %arg15[%c0_39, %c0_40] : memref<1x1xf32, #tpu.memory_space<vmem>>, vector<1x1xf32>
    %66 = vector.broadcast %65 : vector<1x1xf32> to vector<2x1xf32>
    %67 = arith.addf %64, %66 : vector<2x1xf32>
    %68 = arith.negf %67 : vector<2x1xf32>
    %69 = math.exp %68 : vector<2x1xf32>
    %cst_41 = arith.constant 1.000000e+00 : f32
    %70 = vector.broadcast %cst_41 : f32 to vector<2x1xf32>
    %71 = arith.addf %70, %69 : vector<2x1xf32>
    %72 = arith.divf %70, %71 : vector<2x1xf32>
    %c0_42 = arith.constant 0 : index
    %c0_43 = arith.constant 0 : index
    %73 = vector.load %arg16[%c0_42, %c0_43] : memref<2x1xf32, #tpu.memory_space<vmem>>, vector<2x1xf32>
    tpu.vector_store %arg16[%c0_42, %c0_43], %72 {strides = array<i32>} : memref<2x1xf32, #tpu.memory_space<vmem>>, vector<2x1xf32>,
    return
  }
  func.func @transform_0(%arg0: i32) -> (i32, i32) {
    %c0_i32 = arith.constant 0 : i32
    %c0_i32_0 = arith.constant 0 : i32
    return %arg0, %c0_i32 : i32, i32
  }
  func.func @transform_1(%arg0: i32) -> (i32, i32) {
    %c0_i32 = arith.constant 0 : i32
    %c0_i32_0 = arith.constant 0 : i32
    %c0_i32_1 = arith.constant 0 : i32
    return %c0_i32, %c0_i32_0 : i32, i32
  }
  func.func @transform_2(%arg0: i32) -> (i32, i32) {
    %c0_i32 = arith.constant 0 : i32
    %c0_i32_0 = arith.constant 0 : i32
    %c0_i32_1 = arith.constant 0 : i32
    return %c0_i32, %c0_i32_0 : i32, i32
  }
  func.func @transform_3(%arg0: i32) -> (i32, i32) {
    %c0_i32 = arith.constant 0 : i32
    %c0_i32_0 = arith.constant 0 : i32
    %c0_i32_1 = arith.constant 0 : i32
    return %c0_i32, %c0_i32_0 : i32, i32
  }
  func.func @transform_4(%arg0: i32) -> (i32, i32) {
    %c0_i32 = arith.constant 0 : i32
    %c0_i32_0 = arith.constant 0 : i32
    %c0_i32_1 = arith.constant 0 : i32
    return %c0_i32, %c0_i32_0 : i32, i32
  }
  func.func @transform_5(%arg0: i32) -> (i32, i32) {
    %c0_i32 = arith.constant 0 : i32
    %c0_i32_0 = arith.constant 0 : i32
    %c0_i32_1 = arith.constant 0 : i32
    return %c0_i32, %c0_i32_0 : i32, i32
  }
  func.func @transform_6(%arg0: i32) -> (i32, i32) {
    %c0_i32 = arith.constant 0 : i32
    %c0_i32_0 = arith.constant 0 : i32
    %c0_i32_1 = arith.constant 0 : i32
    return %c0_i32, %c0_i32_0 : i32, i32
  }
  func.func @transform_7(%arg0: i32) -> (i32, i32) {
    %c0_i32 = arith.constant 0 : i32
    %c0_i32_0 = arith.constant 0 : i32
    %c0_i32_1 = arith.constant 0 : i32
    return %c0_i32, %c0_i32_0 : i32, i32
  }
  func.func @transform_8(%arg0: i32) -> (i32, i32) {
    %c0_i32 = arith.constant 0 : i32
    %c0_i32_0 = arith.constant 0 : i32
    %c0_i32_1 = arith.constant 0 : i32
    return %c0_i32, %c0_i32_0 : i32, i32
  }
  func.func @transform_9(%arg0: i32) -> (i32, i32) {
    %c0_i32 = arith.constant 0 : i32
    %c0_i32_0 = arith.constant 0 : i32
    %c0_i32_1 = arith.constant 0 : i32
    return %c0_i32, %c0_i32_0 : i32, i32
  }
  func.func @transform_10(%arg0: i32) -> (i32, i32) {
    %c0_i32 = arith.constant 0 : i32
    %c0_i32_0 = arith.constant 0 : i32
    %c0_i32_1 = arith.constant 0 : i32
    return %c0_i32, %c0_i32_0 : i32, i32
  }
  func.func @transform_11(%arg0: i32) -> (i32, i32) {
    %c0_i32 = arith.constant 0 : i32
    %c0_i32_0 = arith.constant 0 : i32
    %c0_i32_1 = arith.constant 0 : i32
    return %c0_i32, %c0_i32_0 : i32, i32
  }
  func.func @transform_12(%arg0: i32) -> (i32, i32) {
    %c0_i32 = arith.constant 0 : i32
    %c0_i32_0 = arith.constant 0 : i32
    %c0_i32_1 = arith.constant 0 : i32
    return %c0_i32, %c0_i32_0 : i32, i32
  }
  func.func @transform_13(%arg0: i32) -> (i32, i32) {
    %c0_i32 = arith.constant 0 : i32
    %c0_i32_0 = arith.constant 0 : i32
    %c0_i32_1 = arith.constant 0 : i32
    return %c0_i32, %c0_i32_0 : i32, i32
  }
  func.func @transform_14(%arg0: i32) -> (i32, i32) {
    %c0_i32 = arith.constant 0 : i32
    %c0_i32_0 = arith.constant 0 : i32
    %c0_i32_1 = arith.constant 0 : i32
    return %c0_i32, %c0_i32_0 : i32, i32
  }
  func.func @transform_15(%arg0: i32) -> (i32, i32) {
    %c0_i32 = arith.constant 0 : i32
    %c0_i32_0 = arith.constant 0 : i32
    return %arg0, %c0_i32 : i32, i32
  }
}

</mosaic_0001>

<bundles_post_ra>
// kernel: tpu_custom_call.1
= control target key start
LH: loop header
LB: loop body
LE: loop exit
PB: predicated region body
PF: predicated region fallthrough
CT: control target
= control target key end

     0   :  { %s1585_s0 = inlined_call_operand.hbm [shape: f32[16,32], index: 0, kind: input, shape index: {}]   ;;  %s1586_s1 = inlined_call_operand.vmem [shape: f32[32,256], index: 1, kind: input, shape index: {}]   ;;  %s1587_s2 = inlined_call_operand.vmem [shape: f32[1,256], index: 2, kind: input, shape index: {}]   ;;  %s1588_s3 = inlined_call_operand.vmem [shape: f32[64,4], index: 3, kind: input, shape index: {}]   ;;  %s1589_s4 = inlined_call_operand.vmem [shape: f32[4,64], index: 4, kind: input, shape index: {}]   ;;  %s1590_s5 = inlined_call_operand.hbm [shape: f32[64,64], index: 5, kind: input, shape index: {}]   ;;  %s1591_s6 = inlined_call_operand.vmem [shape: f32[1,64], index: 6, kind: input, shape index: {}]   ;;  %s1592_s7 = inlined_call_operand.hbm [shape: f32[64,64], index: 7, kind: input, shape index: {}]   ;;  %s1593_s8 = inlined_call_operand.vmem [shape: f32[1,64], index: 8, kind: input, shape index: {}]   ;;  %s1594_s9 = inlined_call_operand.hbm [shape: f32[64,64], index: 9, kind: input, shape index: {}]   ;;  %s1595_s10 = inlined_call_operand.vmem [shape: f32[1,64], index: 10, kind: input, shape index: {}]   ;;  %s1596_s11 = inlined_call_operand.hbm [shape: f32[64,128], index: 11, kind: input, shape index: {}]   ;;  %s1597_s12 = inlined_call_operand.vmem [shape: f32[1,128], index: 12, kind: input, shape index: {}]   ;;  %s1598_s13 = inlined_call_operand.vmem [shape: f32[1,128], index: 13, kind: input, shape index: {}]   ;;  %s1599_s14 = inlined_call_operand.<no memory space> [shape: f32[1,1], index: 14, kind: input, shape index: {}]   ;;  %s1600_s15 = inlined_call_operand.vmem [shape: f32[2,1], index: 15, kind: output, shape index: {}]  }
   0x1   :  { %v20_v0 = vstv %s1599_s14 }
   0x2   :  { %21 = vst [vmem:[#allocation2] sm:$0x1] %v20_v0 }
   0x3   :  { %22 = vsyncpa [#allocation4], 0 }
   0x4   :  { %23 = vsyncpa [#allocation6], 0 }
   0x5   :  { %24 = vsyncpa [#allocation9], 0  ;;  %s1271_s20 = smov [#allocation5]   ;;  %s1272_s22 = smov [#allocation8]  }
   0x6   :  { %s50_s21 = sshll.u32 %s1271_s20, 4  ;;  %s78_s23 = sshll.u32 %s1272_s22, 4  ;;  %s51_s21 = int_to_ptr.vmem [resolvable:$true] %s50_s21  ;;  %s1365_s23 = int_to_ptr.vmem [resolvable:$true] %s78_s23 }
   0x7   :  { %s1155_s26 = scalar_lea.hbm %s1590_s5, 1024 }
   0x8   :  { %p1156_p0 = scmp.ne.s32.totalorder %s1590_s5, %s1155_s26  ;;  %p1159_p1 = scmp.lt.u32.totalorder %s1155_s26, %s1590_s5 }
   0xa   :  { %p1161_p2 = pnand %p1159_p1, %p1156_p0 }
   0xc   :  { %1164 = shalt.err (!%p1161_p2)
}
   0xd   :  { %s1165_s30 = scalar_lea.vmem %s51_s21, 1024  ;;  %p1170_p4 = scmp.lt.s32.totalorder %s51_s21, %s51_s21 }
   0xe   :  { %p1166_p3 = scmp.ne.s32.totalorder %s51_s21, %s1165_s30  ;;  %p1171_p5 = scmp.lt.s32.totalorder %s1165_s30, %s1165_s30 }
  0x10   :  { %p1172_p6 = por %p1171_p5, %p1170_p4 }
  0x12   :  { %p1173_p7 = pnand %p1172_p6, %p1166_p3 }
  0x14   :  { %1176 = shalt.err (!%p1173_p7)
}
  0x15   :  { %s1273_s16 = smov 128   ;;  %s1274_s17 = smov 8  }
  0x16   :  { %56 = dma.hbm_to_vmem [thread:$0]  %s1590_s5, 1024, %s51_s21, [#allocation6], %s1273_s16, %s1273_s16, %s1274_s17  }
  0x17   :  { %s1177_s24 = scalar_lea.hbm %s1594_s9, 1024 }
  0x18   :  { %p1178_p8 = scmp.ne.s32.totalorder %s1594_s9, %s1177_s24  ;;  %p1181_p9 = scmp.lt.u32.totalorder %s1177_s24, %s1594_s9 }
  0x1a   :  { %p1183_p10 = pnand %p1181_p9, %p1178_p8 }
  0x1c   :  { %1186 = shalt.err (!%p1183_p10)
}
  0x1d   :  { %s1187_s14 = scalar_lea.vmem %s1365_s23, 1024  ;;  %p1192_p12 = scmp.lt.s32.totalorder %s1365_s23, %s1365_s23 }
  0x1e   :  { %p1188_p11 = scmp.ne.s32.totalorder %s1365_s23, %s1187_s14  ;;  %p1193_p13 = scmp.lt.s32.totalorder %s1187_s14, %s1187_s14 }
  0x20   :  { %p1194_p0 = por %p1193_p13, %p1192_p12 }
  0x22   :  { %p1195_p1 = pnand %p1194_p0, %p1188_p11 }
  0x24   :  { %1198 = shalt.err (!%p1195_p1)
}
  0x25   :  { %84 = dma.hbm_to_vmem [thread:$0]  %s1594_s9, 1024, %s1365_s23, [#allocation9], %s1273_s16, %s1273_s16, %s1274_s17  }
  0x26   :  { %s1275_s29 = smov [#allocation3]   ;;  %s1276_s18 = smov [#allocation7]  }
  0x27   :  { %s30_s30 = sshll.u32 %s1275_s29, 4  ;;  %s64_s19 = sshll.u32 %s1276_s18, 4  ;;  %s31_s30 = int_to_ptr.vmem [resolvable:$true] %s30_s30  ;;  %s1402_s19 = int_to_ptr.vmem [resolvable:$true] %s64_s19 }
  0x28   :  { %s1199_s24 = scalar_lea.hbm %s1585_s0, 256 }
  0x29   :  { %p1200_p2 = scmp.ne.s32.totalorder %s1585_s0, %s1199_s24  ;;  %p1203_p3 = scmp.lt.u32.totalorder %s1199_s24, %s1585_s0 }
  0x2b   :  { %p1205_p4 = pnand %p1203_p3, %p1200_p2 }
  0x2d   :  { %1208 = shalt.err (!%p1205_p4)
}
  0x2e   :  { %s1209_s9 = scalar_lea.vmem %s31_s30, 256  ;;  %p1214_p6 = scmp.lt.s32.totalorder %s31_s30, %s31_s30 }
  0x2f   :  { %p1210_p5 = scmp.ne.s32.totalorder %s31_s30, %s1209_s9  ;;  %p1215_p7 = scmp.lt.s32.totalorder %s1209_s9, %s1209_s9 }
  0x31   :  { %p1216_p8 = por %p1215_p7, %p1214_p6 }
  0x33   :  { %p1217_p9 = pnand %p1216_p8, %p1210_p5 }
  0x35   :  { %1220 = shalt.err (!%p1217_p9)
}
  0x36   :  { %36 = dma.hbm_to_vmem [thread:$0]  %s1585_s0, 256, %s31_s30, [#allocation4], %s1273_s16, %s1273_s16, %s1274_s17  }
  0x37   :  { %s1221_s29 = scalar_lea.hbm %s1592_s7, 1024 }
  0x38   :  { %p1222_p10 = scmp.ne.s32.totalorder %s1592_s7, %s1221_s29  ;;  %p1225_p11 = scmp.lt.u32.totalorder %s1221_s29, %s1592_s7 }
  0x3a   :  { %p1227_p12 = pnand %p1225_p11, %p1222_p10 }
  0x3c   :  { %1230 = shalt.err (!%p1227_p12)
}
  0x3d   :  { %s1231_s25 = scalar_lea.vmem %s1402_s19, 1024  ;;  %p1236_p0 = scmp.lt.s32.totalorder %s1402_s19, %s1402_s19 }
  0x3e   :  { %p1232_p13 = scmp.ne.s32.totalorder %s1402_s19, %s1231_s25  ;;  %p1237_p1 = scmp.lt.s32.totalorder %s1231_s25, %s1231_s25 }
  0x40   :  { %p1238_p2 = por %p1237_p1, %p1236_p0 }
  0x42   :  { %p1239_p3 = pnand %p1238_p2, %p1232_p13 }
  0x44   :  { %1242 = shalt.err (!%p1239_p3)
}
  0x45   :  { %70 = dma.hbm_to_vmem [thread:$0]  %s1592_s7, 1024, %s1402_s19, [#allocation6], %s1273_s16, %s1273_s16, %s1274_s17  }
  0x46   :  { %s1277_s26 = smov [#allocation10]   ;;  %s1243_s23 = scalar_lea.hbm %s1596_s11, 1024 }
  0x47   :  { %s92_s27 = sshll.u32 %s1277_s26, 4  ;;  %p1244_p4 = scmp.ne.s32.totalorder %s1596_s11, %s1243_s23  ;;  %s93_s27 = int_to_ptr.vmem [resolvable:$true] %s92_s27 }
  0x48   :  { %p1247_p5 = scmp.lt.u32.totalorder %s1243_s23, %s1596_s11 }
  0x4a   :  { %p1249_p6 = pnand %p1247_p5, %p1244_p4 }
  0x4c   :  { %1252 = shalt.err (!%p1249_p6)
}
  0x4d   :  { %s1253_s18 = scalar_lea.vmem %s93_s27, 1024  ;;  %p1258_p8 = scmp.lt.s32.totalorder %s93_s27, %s93_s27 }
  0x4e   :  { %p1254_p7 = scmp.ne.s32.totalorder %s93_s27, %s1253_s18  ;;  %p1259_p9 = scmp.lt.s32.totalorder %s1253_s18, %s1253_s18 }
  0x50   :  { %p1260_p10 = por %p1259_p9, %p1258_p8 }
  0x52   :  { %p1261_p11 = pnand %p1260_p10, %p1254_p7 }
  0x54   :  { %1264 = shalt.err (!%p1261_p11)
}
  0x55   :  { %98 = dma.hbm_to_vmem [thread:$0]  %s1596_s11, 1024, %s93_s27, [#allocation9], %s1273_s16, %s1273_s16, %s1274_s17  }
  0x56   :  { %1265 = dma.done.wait [#allocation4], 256  }
  0x57   :  { %1266 = vsyncadd [#allocation4], 4294967040 }
  0x58   :  { %1267 = dma.done.wait [#allocation6], 2048  }
  0x59   :  { %1268 = vsyncadd [#allocation6], 4294965248 }
  0x5a   :  { %1269 = dma.done.wait [#allocation9], 2048  }
  0x5b   :  { %1270 = vsyncadd [#allocation9], 4294965248  ;;  %v1278_v1 = vmov 0.0   ;;  %v123_v2 = vld [vmem:[%s1586_s1 + $0x8] sm:$0xff]  ;;  %v125_v3 = vld [vmem:[%s1586_s1 + $0x18] sm:$0xff]  ;;  %vm142_vm0 = vcmask 261120   ;;  %v132_v16 = vlaneseq }
  0x5c   :  { %213 = vmatprep.mubr.f32.mxu0 %v1278_v1  ;;  %v122_v4 = vld [vmem:[%s1586_s1] sm:$0xff]  ;;  %v1060_v5 = vpack.c.bf16 %v125_v3, %v123_v2  ;;  %v124_v6 = vld [vmem:[%s1586_s1 + $0x10] sm:$0xff]  ;;  %v127_v7 = vld [vmem:[%s1586_s1 + $0x28] sm:$0xff]  ;;  %s1279_s16 = smov 64   ;;  %vm258_vm1 = vcmask 523264   ;;  %vm384_vm2 = vcmask 1043456  }
  0x5d   :  { %v129_v8 = vld [vmem:[%s1586_s1 + $0x38] sm:$0xff]  ;;  %v1062_v9 = vpack.c.bf16 %v124_v6, %v122_v4  ;;  %v126_v11 = vld [vmem:[%s1586_s1 + $0x20] sm:$0xff]  ;;  %v128_v12 = vld [vmem:[%s1586_s1 + $0x30] sm:$0xff]  ;;  %v133_v17 = vshrl.u32 %v132_v16, 7  ;;  %vm338_vm3 = vcmask 31744   ;;  %vm1281_vm4 = vmmov 0  }
  0x5e   :  { %v1064_v10 = vpack.c.bf16 %v129_v8, %v127_v7  ;;  %1061 = vmatprep.subr.bf16.mxu0 %v1060_v5  ;;  %v1066_v13 = vpack.c.bf16 %v128_v12, %v126_v11  ;;  %v120_v14 = vld [vmem:[#allocation3] sm:$0xff]  ;;  %v121_v15 = vld [vmem:[#allocation3 + $0x8] sm:$0xff]  ;;  %v247_v25 = vld [vmem:[%s1588_s3 + $0x18] sm:$0xff]  ;;  %vm496_vm5 = vcmask 1041409   ;;  %vm866_vm6 = vcmask 1041408  }
  0x5f   :  { %1063 = vmatpush1.bf16.msra.mxu0 %v1062_v9  ;;  %v138_v18 = vsub.s32 1, %v133_v17  ;;  %v130_v19 = vld [vmem:[%s1587_s2] sm:$0x3]  ;;  %v245_v21 = vld [vmem:[%s1588_s3 + $0x8] sm:$0xff]  ;;  %v246_v22 = vld [vmem:[%s1588_s3 + $0x10] sm:$0xff]  ;;  %v134_v36 = vsub.s32 0, %v133_v17 }
  0x60   :  { %1065 = vmatprep.subr.bf16.mxu0 %v1064_v10  ;;  %v244_v20 = vld [vmem:[%s1588_s3] sm:$0xff]  ;;  %v1072_v26 = vpack.c.bf16 %v247_v25, %v246_v22  ;;  %v249_v28 = vld [vmem:[%s1588_s3 + $0x28] sm:$0xff]  ;;  %v250_v37 = vld [vmem:[%s1588_s3 + $0x30] sm:$0xff]  ;;  %v228_v42 = vsub.s32 7, %v133_v17  ;;  %vm884_vm7 = vcmask 1024  }
  0x61   :  { %v139_v23 = vrot.slane %v130_v19, %v138_v18  ;;  %v1068_v24 = vpack.c.bf16 %v245_v21, %v244_v20  ;;  %v248_v27 = vld [vmem:[%s1588_s3 + $0x20] sm:$0xff]  ;;  %v251_v38 = vld [vmem:[%s1588_s3 + $0x38] sm:$0xff]  ;;  %v135_v40 = vrot.slane %v130_v19, %v134_v36 }
  0x62   :  { %v1076_v32 = vpack.c.bf16 %v249_v28, %v248_v27  ;;  %v1080_v39 = vpack.c.bf16 %v251_v38, %v250_v37  ;;  %v377_v52 = vld [vmem:[%s1589_s4] sm:$0xf]  ;;  %v483_v37 = vld [vmem:[#allocation5 + $0x20] sm:$0xff] }
  0x63   :  { %1067 = vmatpush1.bf16.msra.mxu0 %v1066_v13  ;;  %1069 = vmatprep.subr.bf16.mxu1 %v1068_v24  ;;  %v484_v38 = vld [vmem:[#allocation5 + $0x28] sm:$0xff] }
  0x64   :  { %1071 = vmatpush3.bf16.msra.mxu1 %v1068_v24  ;;  %979 = vmatprep.subr.msk.mxu0 %vm384_vm2, %v377_v52 }
  0x65   :  { %1073 = vmatprep.subr.bf16.mxu1 %v1072_v26 }
  0x66   :  { %893 = vmatmul.mubr.msk.f32.vlgmr.msra.gmra.mrb[0].mxu0 %vm142_vm0, %v120_v14 }
  0x67   :  { %219 = vmatprep.mubr.f32.mxu0 %v1278_v1  ;;  %980 = vmatpush3.msk.msra.mxu0 %vm384_vm2, %v377_v52 }
  0x68   :  { %1075 = vmatpush3.bf16.msra.mxu1 %v1072_v26 }
  0x69   :  { %1077 = vmatprep.subr.bf16.mxu1 %v1076_v32 }
  0x6a   :  { %894 = vmatmul.mubr.msk.f32.gmra.mrb[2].mxu0 %vm142_vm0, %v121_v15 }
  0x6c   :  { %1079 = vmatpush3.bf16.msra.mxu1 %v1076_v32 }
  0x6d   :  { %1081 = vmatprep.subr.bf16.mxu1 %v1080_v39 }
  0x70   :  { %1083 = vmatpush3.bf16.msra.mxu1 %v1080_v39  ;;  %v1091_v39 = vpack.c.bf16 %v484_v38, %v483_v37  ;;  %v765_v37 = vld [vmem:[#allocation10] sm:$0xff]  ;;  %v766_v38 = vld [vmem:[#allocation10 + $0x8] sm:$0xff] }
 0x139   :  { %v215_v29 = vpop.f32.mrb[0].mxu0 }
 0x13a   :  { %v217_v30 = vpop.f32.mrb[1].mxu0  ;;  %v1507_v41 = vadd.f32 %v215_v29, %v135_v40 }
 0x13b   :  { %v218_v31 = vadd.f32 %v217_v30, %v139_v23  ;;  %v479_v30 = vld [vmem:[#allocation5] sm:$0xff] }
 0x13c   :  { %v229_v43 = vrot.slane %v1507_v41, %v228_v42 }
 0x13d   :  { %v221_v33 = vpop.f32.mrb[2].mxu0  ;;  %236 = vrot.lane.b32.xlu0 %v218_v31, %s1279_s16  ;;  %v480_v31 = vld [vmem:[#allocation5 + $0x8] sm:$0xff] }
 0x13e   :  { %v223_v34 = vpop.f32.mrb[3].mxu0  ;;  %v1510_v44 = vadd.f32 %v221_v33, %v135_v40  ;;  %v1085_v32 = vpack.c.bf16 %v480_v31, %v479_v30  ;;  %v1280_v33 = vmov 0.0|0.0   ;;  %v485_v40 = vld [vmem:[#allocation5 + $0x30] sm:$0xff] }
 0x13f   :  { %v224_v35 = vadd.f32 %v223_v34, %v139_v23  ;;  %1084 = vmatprep.subr.bf16.mxu0 %v1280_v33  ;;  %1096 = vmatprep.subr.bf16.mxu1 %v1280_v33  ;;  %v481_v34 = vld [vmem:[#allocation5 + $0x10] sm:$0xff] }
 0x140   :  { %v233_v47 = vrot.slane %v1510_v44, %v228_v42  ;;  %v486_v42 = vld [vmem:[#allocation5 + $0x38] sm:$0xff] }
 0x141   :  { %238 = vrot.lane.b32.xlu0 %v224_v35, %s1279_s16  ;;  %v482_v35 = vld [vmem:[#allocation5 + $0x18] sm:$0xff] }
 0x142   :  { %v1088_v36 = vpack.c.bf16 %v482_v35, %v481_v34  ;;  %v676_v34 = vld [vmem:[#allocation8 + $0x30] sm:$0xff]  ;;  %v677_v35 = vld [vmem:[#allocation8 + $0x38] sm:$0xff] }
 0x1af   :  { %v1512_v45 = vpop.permute.xlu0 %236 }
 0x1b0   :  { %v242_v46 = vmul.f32 %v1512_v45, %v229_v43  ;;  %v1094_v43 = vpack.c.bf16 %v486_v42, %v485_v40  ;;  %v1121_v40 = vpack.c.bf16 %v766_v38, %v765_v37 }
 0x1b2   :  { %254 = vrot.lane.b32.xlu1 %v242_v46, %s1279_s16  ;;  %v577_v46 = vld [vmem:[#allocation7] sm:$0xff] }
 0x1b3   :  { %v1516_v48 = vpop.permute.xlu0 %238 }
 0x1b4   :  { %v243_v49 = vmul.f32 %v1516_v48, %v233_v47  ;;  %v578_v47 = vld [vmem:[#allocation7 + $0x8] sm:$0xff] }
 0x1b6   :  { %256 = vrot.lane.b32.xlu1 %v243_v49, %s1279_s16  ;;  %v579_v49 = vld [vmem:[#allocation7 + $0x10] sm:$0xff] }
 0x224   :  { %v255_v50 = vpop.permute.xlu1 %254 }
 0x225   :  { %976 = vmatprep.mubr.msk.f32.mxu1 %vm258_vm1, %v255_v50  ;;  %v1097_v50 = vpack.c.bf16 %v578_v47, %v577_v46 }
 0x228   :  { %v257_v51 = vpop.permute.xlu1 %256 }
 0x229   :  { %977 = vmatmul.mubr.msk.f32.vlgmr.msra.gmra.mrb[0].mxu1 %vm258_vm1, %v257_v51  ;;  %v580_v51 = vld [vmem:[#allocation7 + $0x18] sm:$0xff] }
 0x22a   :  { %1019 = vmatprep.mubr.msk.f32.mxu1 %vm1281_vm4, %v1278_v1  ;;  %1098 = vmatpush3.bf16.msra.mxu1 %v1097_v50  ;;  %v1100_v52 = vpack.c.bf16 %v580_v51, %v579_v49  ;;  %v769_v49 = vld [vmem:[#allocation10 + $0x20] sm:$0xff]  ;;  %v770_v50 = vld [vmem:[#allocation10 + $0x28] sm:$0xff] }
 0x22b   :  { %1099 = vmatprep.subr.bf16.mxu1 %v1280_v33  ;;  %v1127_v51 = vpack.c.bf16 %v770_v50, %v769_v49 }
 0x22e   :  { %1101 = vmatpush3.bf16.msra.mxu1 %v1100_v52  ;;  %v771_v52 = vld [vmem:[#allocation10 + $0x30] sm:$0xff] }
 0x22f   :  { %1102 = vmatprep.subr.bf16.mxu1 %v1280_v33 }
 0x2fc   :  { %v978_v53 = vpop.f32.mrb[0].mxu1 }
 0x2fd   :  { %v346_v54 = vsel %vm338_vm3, %v978_v53, -inf  ;;  %v329_v55 = vpop.f32.mrb[1].mxu1 }
 0x2fe   :  { %v347_v56 = vrot.slane %v346_v54, 4  ;;  %v339_v57 = vsel %vm338_vm3, %v329_v55, -inf }
 0x2ff   :  { %v340_v58 = vrot.slane %v339_v57, 4 }
 0x300   :  { %v348_v59 = vmax.f32 %v346_v54, %v347_v56 }
 0x301   :  { %v341_v60 = vmax.f32 %v339_v57, %v340_v58 }
 0x302   :  { %v349_v61 = vrot.slane %v348_v59, 2 }
 0x303   :  { %v342_v62 = vrot.slane %v341_v60, 2 }
 0x304   :  { %v350_v63 = vmax.f32 %v348_v59, %v349_v61 }
 0x305   :  { %v343_v0 = vmax.f32 %v341_v60, %v342_v62 }
 0x306   :  { %v351_v2 = vrot.slane %v350_v63, 1 }
 0x307   :  { %v344_v3 = vrot.slane %v343_v0, 1 }
 0x308   :  { %v352_v4 = vmax.f32 %v350_v63, %v351_v2 }
 0x309   :  { %v345_v5 = vmax.f32 %v343_v0, %v344_v3 }
 0x30a   :  { %v354_v6 = vsub.f32 %v978_v53, %v352_v4 }
 0x30b   :  { %v353_v7 = vsub.f32 %v329_v55, %v345_v5 }
 0x30c   :  { %v357_v8 = vmul.f32 1.442695, %v354_v6 }
 0x30d   :  { %v355_v9 = vmul.f32 1.442695, %v353_v7 }
 0x30e   :  { %1143 = vpow2.f32 %v357_v8  ;;  %v582_v8 = vld [vmem:[#allocation7 + $0x28] sm:$0xff] }
 0x30f   :  { %1145 = vpow2.f32 %v355_v9 }
 0x318   :  { %v1144_v10 = vpop.eup %1143 }
 0x319   :  { %v1146_v11 = vpop.eup %1145  ;;  %v366_v12 = vsel %vm338_vm3, %v1144_v10, 0.0 }
 0x31a   :  { %v367_v13 = vrot.slane %v366_v12, 4  ;;  %v359_v14 = vsel %vm338_vm3, %v1146_v11, 0.0 }
 0x31b   :  { %v360_v15 = vrot.slane %v359_v14, 4 }
 0x31c   :  { %v368_v16 = vadd.f32 %v367_v13, %v366_v12  ;;  %v670_v13 = vld [vmem:[#allocation8] sm:$0xff] }
 0x31d   :  { %v361_v17 = vadd.f32 %v360_v15, %v359_v14  ;;  %v671_v14 = vld [vmem:[#allocation8 + $0x8] sm:$0xff]  ;;  %v672_v15 = vld [vmem:[#allocation8 + $0x10] sm:$0xff] }
 0x31e   :  { %v369_v18 = vrot.slane %v368_v16, 2 }
 0x31f   :  { %v362_v19 = vrot.slane %v361_v17, 2 }
 0x320   :  { %v370_v20 = vadd.f32 %v369_v18, %v368_v16  ;;  %v1109_v16 = vpack.c.bf16 %v671_v14, %v670_v13 }
 0x321   :  { %v363_v21 = vadd.f32 %v362_v19, %v361_v17  ;;  %v673_v17 = vld [vmem:[#allocation8 + $0x18] sm:$0xff]  ;;  %v674_v19 = vld [vmem:[#allocation8 + $0x20] sm:$0xff] }
 0x322   :  { %v371_v22 = vrot.slane %v370_v20, 1  ;;  %v1112_v18 = vpack.c.bf16 %v673_v17, %v672_v15 }
 0x323   :  { %v364_v23 = vrot.slane %v363_v21, 1 }
 0x324   :  { %v372_v24 = vadd.f32 %v371_v22, %v370_v20  ;;  %v675_v20 = vld [vmem:[#allocation8 + $0x28] sm:$0xff] }
 0x325   :  { %v365_v25 = vadd.f32 %v364_v23, %v363_v21  ;;  %v1115_v21 = vpack.c.bf16 %v675_v20, %v674_v19  ;;  %v900_v22 = vld [vmem:[%s1591_s6] ss:$0 sm:$0xff] }
 0x326   :  { %1147 = vrcp.f32 %v372_v24 }
 0x327   :  { %1149 = vrcp.f32 %v365_v25 }
 0x330   :  { %v1148_v26 = vpop.eup %1147 }
 0x331   :  { %v1150_v27 = vpop.eup %1149  ;;  %v376_v29 = vmul.f32 %v1148_v26, %v1144_v10  ;;  %v583_v10 = vld [vmem:[#allocation7 + $0x30] sm:$0xff] }
 0x332   :  { %v375_v28 = vmul.f32 %v1150_v27, %v1146_v11  ;;  %v584_v11 = vld [vmem:[#allocation7 + $0x38] sm:$0xff] }
 0x333   :  { %v1106_v12 = vpack.c.bf16 %v584_v11, %v583_v10 }
 0x334   :  { %981 = vmatprep.mubr.msk.f32.mxu0 %vm338_vm3, %v375_v28 }
 0x335   :  { %982 = vmatmul.mubr.msk.f32.vlgmr.msra.gmra.mrb[4].mxu0 %vm338_vm3, %v376_v29 }
 0x336   :  { %1086 = vmatpush3.bf16.msra.mxu0 %v1085_v32  ;;  %1000 = vmatprep.mubr.msk.f32.mxu0 %vm1281_vm4, %v1278_v1 }
 0x337   :  { %1087 = vmatprep.subr.bf16.mxu0 %v1280_v33 }
 0x33a   :  { %1089 = vmatpush3.bf16.msra.mxu0 %v1088_v36  ;;  %v1118_v36 = vpack.c.bf16 %v677_v35, %v676_v34 }
 0x33b   :  { %1090 = vmatprep.subr.bf16.mxu0 %v1280_v33 }
 0x33e   :  { %1092 = vmatpush3.bf16.msra.mxu0 %v1091_v39  ;;  %v767_v39 = vld [vmem:[#allocation10 + $0x10] sm:$0xff] }
 0x33f   :  { %1093 = vmatprep.subr.bf16.mxu0 %v1280_v33 }
 0x342   :  { %1095 = vmatpush3.bf16.msra.mxu0 %v1094_v43 }
 0x343   :  { %1108 = vmatprep.subr.bf16.mxu0 %v1280_v33 }
 0x408   :  { %v983_v53 = vpop.f32.mrb[4].mxu0 }
 0x409   :  { %v464_v54 = vmul.f32 %v983_v53, %v1516_v48  ;;  %v454_v55 = vpop.f32.mrb[5].mxu0  ;;  %v772_v53 = vld [vmem:[#allocation10 + $0x38] sm:$0xff] }
 0x40a   :  { %v463_v56 = vmul.f32 %v454_v55, %v1512_v45  ;;  %v581_v45 = vld [vmem:[#allocation7 + $0x20] sm:$0xff]  ;;  %v904_v55 = vld [vmem:[%s1595_s10] ss:$0 sm:$0xff] }
 0x40b   :  { %v472_v57 = vsel %vm258_vm1, %v464_v54, 0.0  ;;  %v1103_v9 = vpack.c.bf16 %v582_v8, %v581_v45  ;;  %v1130_v54 = vpack.c.bf16 %v772_v53, %v771_v52  ;;  %v909_v8 = vld [vmem:[#allocation2] ss:$0 sm:$0xff] }
 0x40c   :  { %v473_v58 = vrot.slane %v472_v57, 4  ;;  %v465_v59 = vsel %vm258_vm1, %v463_v56, 0.0 }
 0x40d   :  { %v466_v60 = vrot.slane %v465_v59, 4  ;;  %1104 = vmatpush3.bf16.msra.mxu1 %v1103_v9 }
 0x40e   :  { %v474_v61 = vadd.f32 %v473_v58, %v472_v57  ;;  %1105 = vmatprep.subr.bf16.mxu1 %v1280_v33 }
 0x40f   :  { %v467_v62 = vadd.f32 %v466_v60, %v465_v59 }
 0x410   :  { %v475_v63 = vrot.slane %v474_v61, 2 }
 0x411   :  { %v468_v0 = vrot.slane %v467_v62, 2  ;;  %1107 = vmatpush3.bf16.msra.mxu1 %v1106_v12 }
 0x412   :  { %v476_v2 = vadd.f32 %v475_v63, %v474_v61  ;;  %1120 = vmatprep.subr.bf16.mxu1 %v1280_v33 }
 0x413   :  { %v469_v3 = vadd.f32 %v468_v0, %v467_v62 }
 0x414   :  { %v477_v4 = vrot.slane %v476_v2, 1 }
 0x415   :  { %v470_v5 = vrot.slane %v469_v3, 1 }
 0x416   :  { %v478_v6 = vadd.f32 %v477_v4, %v476_v2 }
 0x417   :  { %v471_v48 = vadd.f32 %v470_v5, %v469_v3 }
 0x419   :  { %v497_v7 = vsel %vm496_vm5, %v478_v6, %v471_v48  ;;  %v908_v6 = vld [vmem:[%s1598_s13] ss:$0 sm:$0xff] }
 0x41a   :  { %1001 = vmatmul.mubr.msk.f32.vlgmr.msra.gmra.mrb[6].mxu0 %vm258_vm1, %v497_v7 }
 0x41b   :  { %1038 = vmatprep.mubr.msk.f32.mxu0 %vm1281_vm4, %v1278_v1  ;;  %1110 = vmatpush3.bf16.msra.mxu0 %v1109_v16 }
 0x41c   :  { %1111 = vmatprep.subr.bf16.mxu0 %v1280_v33 }
 0x41f   :  { %1113 = vmatpush3.bf16.msra.mxu0 %v1112_v18 }
 0x420   :  { %1114 = vmatprep.subr.bf16.mxu0 %v1280_v33 }
 0x423   :  { %1116 = vmatpush3.bf16.msra.mxu0 %v1115_v21 }
 0x424   :  { %1117 = vmatprep.subr.bf16.mxu0 %v1280_v33 }
 0x427   :  { %1119 = vmatpush3.bf16.msra.mxu0 %v1118_v36 }
 0x4ed   :  { %v566_v23 = vpop.f32.mrb[6].mxu0 }
 0x4ee   :  { %v567_v24 = vadd.f32 %v900_v22, %v566_v23  ;;  %v1002_v25 = vpop.f32.mrb[7].mxu0 }
 0x4f0   :  { %v571_v26 = vrot.slane %v567_v24, 1  ;;  %v572_v27 = vrot.slane %v567_v24, 2 }
 0x4f2   :  { %v575_v28 = vadd.f32 %v571_v26, %v1507_v41  ;;  %v576_v29 = vadd.f32 %v572_v27, %v1510_v44  ;;  %v768_v41 = vld [vmem:[#allocation10 + $0x18] sm:$0xff] }
 0x4f3   :  { %v1124_v44 = vpack.c.bf16 %v768_v41, %v767_v39 }
 0x4f4   :  { %v594_v30 = vrot.slane %v575_v28, 7  ;;  %v595_v31 = vrot.slane %v576_v29, 6 }
 0x4f6   :  { %v596_v32 = vsel %vm496_vm5, %v595_v31, %v594_v30 }
 0x4f7   :  { %1020 = vmatmul.mubr.msk.f32.vlgmr.msra.gmra.mrb[2].mxu1 %vm258_vm1, %v596_v32 }
 0x4f8   :  { %1057 = vmatprep.mubr.msk.f32.mxu1 %vm1281_vm4, %v1278_v1  ;;  %1122 = vmatpush3.bf16.msra.mxu1 %v1121_v40  ;;  %v902_v1 = vld [vmem:[%s1593_s8] ss:$0 sm:$0xff] }
 0x4f9   :  { %1123 = vmatprep.subr.bf16.mxu1 %v1280_v33 }
 0x4fc   :  { %1125 = vmatpush3.bf16.msra.mxu1 %v1124_v44 }
 0x4fd   :  { %1126 = vmatprep.subr.bf16.mxu1 %v1280_v33 }
 0x500   :  { %1128 = vmatpush3.bf16.msra.mxu1 %v1127_v51 }
 0x501   :  { %1129 = vmatprep.subr.bf16.mxu1 %v1280_v33  ;;  %v906_v33 = vld [vmem:[%s1597_s12] ss:$0 sm:$0xff] }
 0x504   :  { %1131 = vmatpush3.bf16.msra.mxu1 %v1130_v54 }
 0x5ca   :  { %v665_v42 = vpop.f32.mrb[2].mxu1 }
 0x5cb   :  { %v666_v43 = vadd.f32 %v902_v1, %v665_v42  ;;  %v1021_v46 = vpop.f32.mrb[3].mxu1 }
 0x5cd   :  { %v669_v47 = vmax.f32 %v666_v43, 0.0 }
 0x5cf   :  { %1039 = vmatmul.mubr.msk.f32.vlgmr.msra.gmra.mrb[8].mxu0 %vm258_vm1, %v669_v47 }
 0x6a2   :  { %v754_v56 = vpop.f32.mrb[8].mxu0 }
 0x6a3   :  { %v755_v57 = vadd.f32 %v904_v55, %v754_v56  ;;  %v1040_v58 = vpop.f32.mrb[9].mxu0 }
 0x6a5   :  { %v759_v59 = vrot.slane %v755_v57, 1  ;;  %v760_v60 = vrot.slane %v755_v57, 2 }
 0x6a7   :  { %v763_v61 = vadd.f32 %v759_v59, %v575_v28  ;;  %v764_v62 = vadd.f32 %v760_v60, %v576_v29 }
 0x6a9   :  { %v782_v63 = vrot.slane %v763_v61, 7  ;;  %v783_v0 = vrot.slane %v764_v62, 6 }
 0x6ab   :  { %v784_v2 = vsel %vm496_vm5, %v783_v0, %v782_v63 }
 0x6ac   :  { %1058 = vmatmul.mubr.msk.f32.vlgmr.msra.gmra.mrb[4].mxu1 %vm258_vm1, %v784_v2 }
 0x77f   :  { %v853_v3 = vpop.f32.mrb[4].mxu1 }
 0x780   :  { %v854_v4 = vadd.f32 %v906_v33, %v853_v3  ;;  %v1059_v5 = vpop.f32.mrb[5].mxu1 }
 0x782   :  { %v857_v48 = vmax.f32 %v854_v4, 0.0 }
 0x784   :  { %v865_v7 = vmul.f32 %v908_v6, %v857_v48 }
 0x786   :  { %v867_v45 = vsel %vm866_vm6, %v865_v7, 0.0 }
 0x787   :  { %868 = vadd.xlane.f32.xlu0 %v867_v45 }
 0x814   :  { %v869_v9 = vpop.xlane.xlu0 %868 }
 0x815   :  { %v877_v10 = vadd.f32 %v909_v8, %v869_v9 }
 0x817   :  { %v910_v11 = vmul.f32 -1.442695, %v877_v10 }
 0x819   :  { %1151 = vpow2.f32 %v910_v11 }
 0x823   :  { %v1152_v12 = vpop.eup %1151 }
 0x824   :  { %v881_v13 = vadd.f32 1.0, %v1152_v12 }
 0x826   :  { %1153 = vrcp.f32 %v881_v13 }
 0x830   :  { %v1154_v14 = vpop.eup %1153 }
 0x831   :  { %885 = vst.msk [vmem:[%s1600_s15] sm:$0x3] %vm884_vm7, %v1154_v14 }
 0x832   :  { %890 = vsyncpa [#allocation4], 1 }
 0x833   :  { %891 = vsyncpa [#allocation6], 1 }
 0x834   :  { %892 = vsyncpa [#allocation9], 1 }

</bundles_post_ra>
